<compile_context>
chip_gen: v7x
topology: tpu7x:2x2x1
jax: 0.10.0
libtpu: 0.0.40
codegen_flags: <defaults>
</compile_context>

<pallas_src>
import functools

import jax
import jax.numpy as jnp
from jax import lax
from jax.experimental import pallas as pl
from jax.experimental.pallas import tpu as pltpu


def _round_up(v, m):
    return ((v + m - 1) // m) * m


def _pick_tile(dim_pad, pref):
    for t in (pref, 1024, 512, 256, 128):
        if t <= dim_pad and dim_pad % t == 0:
            return t
    return dim_pad


# --------------------------------------------------------------------------
# Kernel 1: tiled Linear (bf16 MXU, f32 acc) + batch-statistics accumulation
# grid = (col_tiles[parallel], row_tiles[arbitrary], k_tiles[arbitrary])
# --------------------------------------------------------------------------
def _linear_stats_kernel(x_ref, w_ref, b_ref, y_ref, s1_ref, s2_ref, acc_ref,
                         *, n_pad_rows):
    i = pl.program_id(1)          # batch-row tile (reduction axis for stats)
    k = pl.program_id(2)          # contraction tile
    nr = pl.num_programs(1)
    nk = pl.num_programs(2)

    @pl.when((i == 0) & (k == 0))
    def _init_stats():
        s1_ref[...] = jnp.zeros_like(s1_ref)
        s2_ref[...] = jnp.zeros_like(s2_ref)

    @pl.when(k == 0)
    def _init_acc():
        acc_ref[...] = jnp.zeros_like(acc_ref)

    # ---- MXU: bf16 x bf16 -> f32 accumulate ----
    acc_ref[...] += jnp.dot(x_ref[...], w_ref[...],
                            preferred_element_type=jnp.float32)

    @pl.when(k == nk - 1)
    def _finish():
        y = acc_ref[...] + b_ref[...]                 # f32
        y_ref[...] = y.astype(y_ref.dtype)            # bf16 intermediate store
        s1_ref[...] += jnp.sum(y, axis=0, keepdims=True)
        s2_ref[...] += jnp.sum(y * y, axis=0, keepdims=True)

    if n_pad_rows > 0:
        @pl.when((i == nr - 1) & (k == nk - 1))
        def _correct_padding():
            # Padded batch rows (zero x) produce exactly y == b; remove their
            # contribution from the statistics analytically (no per-element mask).
            pad = jnp.float32(n_pad_rows)
            bvec = b_ref[...]
            s1_ref[...] -= pad * bvec
            s2_ref[...] -= pad * (bvec * bvec)


# --------------------------------------------------------------------------
# Kernel 2: BatchNorm (batch stats) + LeakyReLU(0.2) + inverted Dropout
# grid = (col_tiles[parallel], row_tiles[parallel])
# --------------------------------------------------------------------------
def _bn_act_dropout_kernel(seed_ref, y_ref, s1_ref, s2_ref, g_ref, be_ref, o_ref,
                           *, n_true, do_rate, training, eps, use_hw_prng):
    inv_n = jnp.float32(1.0 / n_true)
    mean = s1_ref[...] * inv_n                                   # (1, tc)
    var = jnp.maximum(s2_ref[...] * inv_n - mean * mean, 0.0)
    inv_std = lax.rsqrt(var + jnp.float32(eps))
    scale = g_ref[...] * inv_std
    shift = be_ref[...] - mean * scale

    y = y_ref[...].astype(jnp.float32)      # upcast bf16 -> f32 (v5e VPU has no bf16)
    y_bn = y * scale + shift

    # ---- LeakyReLU(0.2) ----
    a = jnp.where(y_bn >= 0.0, y_bn, jnp.float32(0.2) * y_bn)

    # ---- Dropout (inverted, uint32 threshold compare) ----
    if training and do_rate > 0.0:
        thresh = jnp.uint32(min(int(round(do_rate * 4294967296.0)), 4294967295))
        if use_hw_prng:
            tile_id = pl.program_id(0) * pl.num_programs(1) + pl.program_id(1)
            pltpu.prng_seed(seed_ref[0] + tile_id)
            bits = pltpu.prng_random_bits(a.shape)
            if bits.dtype != jnp.uint32:
                bits = pltpu.bitcast(bits, jnp.uint32)
        else:
            # Portable counter-based hash (non-TPU / interpret fallback only).
            tn, tc = a.shape
            row = (pl.program_id(1) * tn
                   + lax.broadcasted_iota(jnp.int32, a.shape, 0)).astype(jnp.uint32)
            col = (pl.program_id(0) * tc
                   + lax.broadcasted_iota(jnp.int32, a.shape, 1)).astype(jnp.uint32)
            h = (row * jnp.uint32(0x9E3779B1) + col * jnp.uint32(0x85EBCA77)
                 + seed_ref[0].astype(jnp.uint32))
            h = h ^ (h >> 16)
            h = h * jnp.uint32(0x7FEB352D)
            h = h ^ (h >> 15)
            h = h * jnp.uint32(0x846CA68B)
            h = h ^ (h >> 16)
            bits = h
        keep = bits >= thresh
        a = jnp.where(keep, a * jnp.float32(1.0 / (1.0 - do_rate)), 0.0)

    o_ref[...] = a.astype(o_ref.dtype)


# --------------------------------------------------------------------------
# Wrapper
# --------------------------------------------------------------------------
def encoder_block(x, w, b, gamma, beta, *, do_rate, training, seed=0, eps=1e-5,
                  tile_n=512, tile_c=512, tile_k=512):
    """x: (N, in_dim); w: (in_dim, out_dim) == torch weight transposed;
    b/gamma/beta: (out_dim,). Returns (N, out_dim) float32."""
    n, in_dim = x.shape
    in_dim_w, out_dim = w.shape
    assert in_dim_w == in_dim

    f32, bf16 = jnp.float32, jnp.bfloat16
    in_pad = _round_up(in_dim, 128)              # lane-dense contraction dim
    out_pad = _round_up(out_dim, 128)            # lane-dense output dim

    tn = min(int(tile_n), _round_up(n, 16))      # bf16-native sublane multiple
    n_pad = _round_up(n, tn)
    tc = _pick_tile(out_pad, int(tile_c))
    tk = _pick_tile(in_pad, int(tile_k))
    nr, nc, nk = n_pad // tn, out_pad // tc, in_pad // tk

    # --- pad + cast operands (skipped when already aligned & typed) ---
    if (n_pad, in_pad) == (n, in_dim) and x.dtype == bf16:
        x_p = x
    else:
        x_p = jnp.zeros((n_pad, in_pad), bf16).at[:n, :in_dim].set(x.astype(bf16))
    if (in_pad, out_pad) == (in_dim, out_dim) and w.dtype == bf16:
        w_p = w
    else:
        w_p = jnp.zeros((in_pad, out_pad), bf16).at[:in_dim, :out_dim].set(w.astype(bf16))
    b_p = jnp.zeros((1, out_pad), f32).at[0, :out_dim].set(b.astype(f32))
    g_p = jnp.ones((1, out_pad), f32).at[0, :out_dim].set(gamma.astype(f32))
    be_p = jnp.zeros((1, out_pad), f32).at[0, :out_dim].set(beta.astype(f32))
    seed_arr = jnp.asarray(seed, dtype=jnp.int32).reshape((1,))

    on_tpu = jax.default_backend() == "tpu"

    def _params(sem, est_vmem_bytes):
        if not on_tpu:
            return {}
        limit = int(min(48 * 1024 * 1024, max(2 * est_vmem_bytes, 8 * 1024 * 1024)))
        return dict(compiler_params=pltpu.CompilerParams(
            dimension_semantics=sem, vmem_limit_bytes=limit))

    # ---- call 1: tiled Linear + stats accumulation ----
    vmem1 = (2 * tn * tk * 2 + 2 * tk * tc * 2 + 2 * tn * tc * 2
             + tn * tc * 4 + 6 * tc * 4)
    cost1 = pl.CostEstimate(
        flops=int(2 * n_pad * in_pad * out_pad),
        transcendentals=0,
        bytes_accessed=int(n_pad * in_pad * 2 + in_pad * out_pad * 2
                           + n_pad * out_pad * 2 + 3 * out_pad * 4))
    k1 = functools.partial(_linear_stats_kernel, n_pad_rows=n_pad - n)
    y, s1, s2 = pl.pallas_call(
        k1,
        out_shape=(jax.ShapeDtypeStruct((n_pad, out_pad), bf16),
                   jax.ShapeDtypeStruct((1, out_pad), f32),
                   jax.ShapeDtypeStruct((1, out_pad), f32)),
        grid=(nc, nr, nk),
        in_specs=[
            pl.BlockSpec((tn, tk), lambda j, i, k: (i, k)),    # x tile (bf16)
            pl.BlockSpec((tk, tc), lambda j, i, k: (k, j)),    # W tile (bf16)
            pl.BlockSpec((1, tc), lambda j, i, k: (0, j)),     # bias tile (f32)
        ],
        out_specs=(
            pl.BlockSpec((tn, tc), lambda j, i, k: (i, j)),    # y tile (bf16)
            pl.BlockSpec((1, tc), lambda j, i, k: (0, j)),     # sum   (accumulator)
            pl.BlockSpec((1, tc), lambda j, i, k: (0, j)),     # sumsq (accumulator)
        ),
        scratch_shapes=[pltpu.VMEM((tn, tc), jnp.float32)],    # f32 matmul accumulator
        cost_estimate=cost1,
        **_params(("parallel", "arbitrary", "arbitrary"), vmem1),
    )(x_p, w_p, b_p)

    # ---- call 2: BN + LeakyReLU + Dropout (embarrassingly parallel) ----
    vmem2 = 2 * tn * tc * 2 + 2 * tn * tc * 4 + 8 * tc * 4
    cost2 = pl.CostEstimate(
        flops=int(10 * n_pad * out_pad),
        transcendentals=int(out_pad),
        bytes_accessed=int(n_pad * out_pad * (2 + 4) + 5 * out_pad * 4))
    k2 = functools.partial(
        _bn_act_dropout_kernel, n_true=n, do_rate=float(do_rate),
        training=bool(training), eps=float(eps), use_hw_prng=on_tpu)
    out = pl.pallas_call(
        k2,
        out_shape=jax.ShapeDtypeStruct((n_pad, out_pad), f32),
        grid=(nc, nr),
        in_specs=[
            pl.BlockSpec(memory_space=pltpu.MemorySpace.SMEM),  # dropout seed scalar
            pl.BlockSpec((tn, tc), lambda j, i: (i, j)),        # y tile (bf16)
            pl.BlockSpec((1, tc), lambda j, i: (0, j)),         # sum
            pl.BlockSpec((1, tc), lambda j, i: (0, j)),         # sumsq
            pl.BlockSpec((1, tc), lambda j, i: (0, j)),         # gamma
            pl.BlockSpec((1, tc), lambda j, i: (0, j)),         # beta
        ],
        out_specs=pl.BlockSpec((tn, tc), lambda j, i: (i, j)),
        cost_estimate=cost2,
        **_params(("parallel", "parallel"), vmem2),
    )(seed_arr, y, s1, s2, g_p, be_p)

    return out[:n, :out_dim]


# --------------------------------------------------------------------------
# Pure-JAX reference (dropout disabled), training-mode BatchNorm (batch stats),
# bf16 matmul to match the kernel's MXU precision.
# --------------------------------------------------------------------------
def _reference_no_dropout(x, w, b, gamma, beta, eps=1e-5):
    y = jnp.dot(x.astype(jnp.bfloat16), w.astype(jnp.bfloat16),
                preferred_element_type=jnp.float32) + b[None, :].astype(jnp.float32)
    mean = jnp.mean(y, axis=0, keepdims=True)
    var = jnp.mean((y - mean) ** 2, axis=0, keepdims=True)
    y_bn = (y - mean) / jnp.sqrt(var + eps) * gamma[None, :] + beta[None, :]
    return jnp.where(y_bn >= 0.0, y_bn, 0.2 * y_bn)


if __name__ == "__main__":
    # Small shapes consistent with the module: a batch of feature vectors.
    N, IN_DIM, OUT_DIM = 8, 16, 32
    DO_RATE = 0.1

    key = jax.random.PRNGKey(0)
    kx, kw, kb, kg, kbe = jax.random.split(key, 5)

    x = jax.random.normal(kx, (N, IN_DIM), dtype=jnp.float32)
    # torch Linear weight is (out, in); the kernel takes its transpose (in, out).
    w = jax.random.normal(kw, (IN_DIM, OUT_DIM), dtype=jnp.float32) * 0.1
    b = jax.random.normal(kb, (OUT_DIM,), dtype=jnp.float32) * 0.1
    gamma = 1.0 + 0.1 * jax.random.normal(kg, (OUT_DIM,), dtype=jnp.float32)
    beta = 0.1 * jax.random.normal(kbe, (OUT_DIM,), dtype=jnp.float32)

    # Deterministic path (dropout off) vs pure-JAX reference (bf16 matmul precision).
    out_eval = encoder_block(x, w, b, gamma, beta, do_rate=DO_RATE, training=False)
    out_eval = jax.block_until_ready(out_eval)
    ref = _reference_no_dropout(x, w, b, gamma, beta)
    assert out_eval.shape == (N, OUT_DIM)
    assert jnp.allclose(out_eval, ref, atol=1e-2, rtol=1e-2), "mismatch vs reference"

    # Training path: inverted dropout -> every element is either 0 or eval/(1-p).
    out_train = encoder_block(x, w, b, gamma, beta, do_rate=DO_RATE,
                              training=True, seed=1234)
    out_train = jax.block_until_ready(out_train)
    assert out_train.shape == (N, OUT_DIM)
    assert bool(jnp.all(jnp.isfinite(out_train)))
    scaled = out_eval / (1.0 - DO_RATE)
    ok = (out_train == 0.0) | jnp.isclose(out_train, scaled, atol=1e-3, rtol=1e-3)
    assert bool(jnp.all(ok)), "dropout output is not {0, scaled activation}"
    kept_frac = float(jnp.mean((out_train != 0.0).astype(jnp.float32)))
    assert kept_frac > 0.5, "dropout dropped far too many elements"

    print("KERNEL_OK")
</pallas_src>

<mosaic_0001>
module attributes {stable_mosaic.version = 11 : i64} {
  func.func @_linear_stats_kernel(%arg0: i32, %arg1: i32, %arg2: i32, %arg3: memref<16x128xbf16, #tpu.memory_space<vmem>>, %arg4: memref<128x128xbf16, #tpu.memory_space<vmem>>, %arg5: memref<1x128xf32, #tpu.memory_space<vmem>>, %arg6: memref<16x128xbf16, #tpu.memory_space<vmem>>, %arg7: memref<1x128xf32, #tpu.memory_space<vmem>>, %arg8: memref<1x128xf32, #tpu.memory_space<vmem>>, %arg9: memref<16x128xf32, #tpu.memory_space<vmem>>) attributes {dimension_semantics = [#tpu.dimension_semantics<arbitrary>, #tpu.dimension_semantics<arbitrary>, #tpu.dimension_semantics<arbitrary>], iteration_bounds = array<i64: 1, 1, 1>, scalar_prefetch = 0 : i64, scratch_operands = 1 : i64, tpu.core_type = #tpu.core_type<tc>, window_params = [{transform_indices = @transform_0, window_bounds = array<i64: 16, 128>}, {transform_indices = @transform_1, window_bounds = array<i64: 128, 128>}, {transform_indices = @transform_2, window_bounds = array<i64: 1, 128>}, {transform_indices = @transform_3, window_bounds = array<i64: 16, 128>}, {transform_indices = @transform_4, window_bounds = array<i64: 1, 128>}, {transform_indices = @transform_5, window_bounds = array<i64: 1, 128>}]} {
    %c0_i32 = arith.constant 0 : i32
    %0 = arith.cmpi eq, %arg1, %c0_i32 : i32
    %c0_i32_0 = arith.constant 0 : i32
    %1 = arith.cmpi eq, %arg2, %c0_i32_0 : i32
    %2 = arith.andi %0, %1 : i1
    %3 = arith.extui %2 : i1 to i32
    %c0_i32_1 = arith.constant 0 : i32
    %4 = arith.cmpi ne, %3, %c0_i32_1 : i32
    scf.if %4 {
      %cst_16 = arith.constant 0.000000e+00 : f32
      %22 = vector.broadcast %cst_16 : f32 to vector<1x128xf32>
      %c0_17 = arith.constant 0 : index
      %c0_18 = arith.constant 0 : index
      %23 = vector.load %arg7[%c0_17, %c0_18] : memref<1x128xf32, #tpu.memory_space<vmem>>, vector<1x128xf32>
      tpu.vector_store %arg7[%c0_17, %c0_18], %22 {strides = array<i32>} : memref<1x128xf32, #tpu.memory_space<vmem>>, vector<1x128xf32>,
      %cst_19 = arith.constant 0.000000e+00 : f32
      %24 = vector.broadcast %cst_19 : f32 to vector<1x128xf32>
      %c0_20 = arith.constant 0 : index
      %c0_21 = arith.constant 0 : index
      %25 = vector.load %arg8[%c0_20, %c0_21] : memref<1x128xf32, #tpu.memory_space<vmem>>, vector<1x128xf32>
      tpu.vector_store %arg8[%c0_20, %c0_21], %24 {strides = array<i32>} : memref<1x128xf32, #tpu.memory_space<vmem>>, vector<1x128xf32>,
    } else {
    }
    %c0_i32_2 = arith.constant 0 : i32
    %5 = arith.cmpi eq, %arg2, %c0_i32_2 : i32
    %6 = arith.extui %5 : i1 to i32
    %c0_i32_3 = arith.constant 0 : i32
    %7 = arith.cmpi ne, %6, %c0_i32_3 : i32
    scf.if %7 {
      %cst_16 = arith.constant 0.000000e+00 : f32
      %22 = vector.broadcast %cst_16 : f32 to vector<16x128xf32>
      %c0_17 = arith.constant 0 : index
      %c0_18 = arith.constant 0 : index
      %23 = vector.load %arg9[%c0_17, %c0_18] : memref<16x128xf32, #tpu.memory_space<vmem>>, vector<16x128xf32>
      tpu.vector_store %arg9[%c0_17, %c0_18], %22 {strides = array<i32>} : memref<16x128xf32, #tpu.memory_space<vmem>>, vector<16x128xf32>,
    } else {
    }
    %c0 = arith.constant 0 : index
    %c0_4 = arith.constant 0 : index
    %8 = vector.load %arg9[%c0, %c0_4] : memref<16x128xf32, #tpu.memory_space<vmem>>, vector<16x128xf32>
    %c0_5 = arith.constant 0 : index
    %c0_6 = arith.constant 0 : index
    %9 = vector.load %arg3[%c0_5, %c0_6] : memref<16x128xbf16, #tpu.memory_space<vmem>>, vector<16x128xbf16>
    %c0_7 = arith.constant 0 : index
    %c0_8 = arith.constant 0 : index
    %10 = vector.load %arg4[%c0_7, %c0_8] : memref<128x128xbf16, #tpu.memory_space<vmem>>, vector<128x128xbf16>
    %cst = arith.constant dense<0.000000e+00> : vector<16x128xf32>
    %11 = tpu.matmul %9, %10, %cst {dimension_numbers = #tpu.dot_dimension_numbers<[1], [0], [0], [1], [0, 0, 1, 1], [], []>} : vector<16x128xbf16>, vector<128x128xbf16>, vector<16x128xf32> -> vector<16x128xf32>
    %12 = arith.addf %8, %11 : vector<16x128xf32>
    %c0_9 = arith.constant 0 : index
    %c0_10 = arith.constant 0 : index
    %13 = vector.load %arg9[%c0_9, %c0_10] : memref<16x128xf32, #tpu.memory_space<vmem>>, vector<16x128xf32>
    tpu.vector_store %arg9[%c0_9, %c0_10], %12 {strides = array<i32>} : memref<16x128xf32, #tpu.memory_space<vmem>>, vector<16x128xf32>,
    %c0_i32_11 = arith.constant 0 : i32
    %14 = arith.cmpi eq, %arg2, %c0_i32_11 : i32
    %15 = arith.extui %14 : i1 to i32
    %c0_i32_12 = arith.constant 0 : i32
    %16 = arith.cmpi ne, %15, %c0_i32_12 : i32
    scf.if %16 {
      %c0_16 = arith.constant 0 : index
      %c0_17 = arith.constant 0 : index
      %22 = vector.load %arg9[%c0_16, %c0_17] : memref<16x128xf32, #tpu.memory_space<vmem>>, vector<16x128xf32>
      %c0_18 = arith.constant 0 : index
      %c0_19 = arith.constant 0 : index
      %23 = vector.load %arg5[%c0_18, %c0_19] : memref<1x128xf32, #tpu.memory_space<vmem>>, vector<1x128xf32>
      %24 = vector.broadcast %23 : vector<1x128xf32> to vector<16x128xf32>
      %25 = arith.addf %22, %24 : vector<16x128xf32>
      %26 = arith.truncf %25 : vector<16x128xf32> to vector<16x128xbf16>
      %c0_20 = arith.constant 0 : index
      %c0_21 = arith.constant 0 : index
      %27 = vector.load %arg6[%c0_20, %c0_21] : memref<16x128xbf16, #tpu.memory_space<vmem>>, vector<16x128xbf16>
      tpu.vector_store %arg6[%c0_20, %c0_21], %26 {strides = array<i32>} : memref<16x128xbf16, #tpu.memory_space<vmem>>, vector<16x128xbf16>,
      %c0_22 = arith.constant 0 : index
      %c0_23 = arith.constant 0 : index
      %28 = vector.load %arg7[%c0_22, %c0_23] : memref<1x128xf32, #tpu.memory_space<vmem>>, vector<1x128xf32>
      %cst_24 = arith.constant dense<0.000000e+00> : vector<128xf32>
      %29 = vector.multi_reduction <add>, %25, %cst_24 [0] : vector<16x128xf32> to vector<128xf32>
      %30 = vector.shape_cast %29 : vector<128xf32> to vector<1x128xf32>
      %31 = arith.addf %28, %30 : vector<1x128xf32>
      %c0_25 = arith.constant 0 : index
      %c0_26 = arith.constant 0 : index
      %32 = vector.load %arg7[%c0_25, %c0_26] : memref<1x128xf32, #tpu.memory_space<vmem>>, vector<1x128xf32>
      tpu.vector_store %arg7[%c0_25, %c0_26], %31 {strides = array<i32>} : memref<1x128xf32, #tpu.memory_space<vmem>>, vector<1x128xf32>,
      %c0_27 = arith.constant 0 : index
      %c0_28 = arith.constant 0 : index
      %33 = vector.load %arg8[%c0_27, %c0_28] : memref<1x128xf32, #tpu.memory_space<vmem>>, vector<1x128xf32>
      %34 = arith.mulf %25, %25 : vector<16x128xf32>
      %cst_29 = arith.constant dense<0.000000e+00> : vector<128xf32>
      %35 = vector.multi_reduction <add>, %34, %cst_29 [0] : vector<16x128xf32> to vector<128xf32>
      %36 = vector.shape_cast %35 : vector<128xf32> to vector<1x128xf32>
      %37 = arith.addf %33, %36 : vector<1x128xf32>
      %c0_30 = arith.constant 0 : index
      %c0_31 = arith.constant 0 : index
      %38 = vector.load %arg8[%c0_30, %c0_31] : memref<1x128xf32, #tpu.memory_space<vmem>>, vector<1x128xf32>
      tpu.vector_store %arg8[%c0_30, %c0_31], %37 {strides = array<i32>} : memref<1x128xf32, #tpu.memory_space<vmem>>, vector<1x128xf32>,
    } else {
    }
    %c0_i32_13 = arith.constant 0 : i32
    %17 = arith.cmpi eq, %arg1, %c0_i32_13 : i32
    %c0_i32_14 = arith.constant 0 : i32
    %18 = arith.cmpi eq, %arg2, %c0_i32_14 : i32
    %19 = arith.andi %17, %18 : i1
    %20 = arith.extui %19 : i1 to i32
    %c0_i32_15 = arith.constant 0 : i32
    %21 = arith.cmpi ne, %20, %c0_i32_15 : i32
    scf.if %21 {
      %c0_16 = arith.constant 0 : index
      %c0_17 = arith.constant 0 : index
      %22 = vector.load %arg5[%c0_16, %c0_17] : memref<1x128xf32, #tpu.memory_space<vmem>>, vector<1x128xf32>
      %c0_18 = arith.constant 0 : index
      %c0_19 = arith.constant 0 : index
      %23 = vector.load %arg7[%c0_18, %c0_19] : memref<1x128xf32, #tpu.memory_space<vmem>>, vector<1x128xf32>
      %cst_20 = arith.constant 8.000000e+00 : f32
      %24 = vector.broadcast %cst_20 : f32 to vector<1x128xf32>
      %25 = arith.mulf %24, %22 : vector<1x128xf32>
      %26 = arith.subf %23, %25 : vector<1x128xf32>
      %c0_21 = arith.constant 0 : index
      %c0_22 = arith.constant 0 : index
      %27 = vector.load %arg7[%c0_21, %c0_22] : memref<1x128xf32, #tpu.memory_space<vmem>>, vector<1x128xf32>
      tpu.vector_store %arg7[%c0_21, %c0_22], %26 {strides = array<i32>} : memref<1x128xf32, #tpu.memory_space<vmem>>, vector<1x128xf32>,
      %c0_23 = arith.constant 0 : index
      %c0_24 = arith.constant 0 : index
      %28 = vector.load %arg8[%c0_23, %c0_24] : memref<1x128xf32, #tpu.memory_space<vmem>>, vector<1x128xf32>
      %29 = arith.mulf %22, %22 : vector<1x128xf32>
      %cst_25 = arith.constant 8.000000e+00 : f32
      %30 = vector.broadcast %cst_25 : f32 to vector<1x128xf32>
      %31 = arith.mulf %30, %29 : vector<1x128xf32>
      %32 = arith.subf %28, %31 : vector<1x128xf32>
      %c0_26 = arith.constant 0 : index
      %c0_27 = arith.constant 0 : index
      %33 = vector.load %arg8[%c0_26, %c0_27] : memref<1x128xf32, #tpu.memory_space<vmem>>, vector<1x128xf32>
      tpu.vector_store %arg8[%c0_26, %c0_27], %32 {strides = array<i32>} : memref<1x128xf32, #tpu.memory_space<vmem>>, vector<1x128xf32>,
    } else {
    }
    return
  }
  func.func @transform_0(%arg0: i32, %arg1: i32, %arg2: i32) -> (i32, i32) {
    %c0_i32 = arith.constant 0 : i32
    return %arg1, %arg2 : i32, i32
  }
  func.func @transform_1(%arg0: i32, %arg1: i32, %arg2: i32) -> (i32, i32) {
    %c0_i32 = arith.constant 0 : i32
    return %arg2, %arg0 : i32, i32
  }
  func.func @transform_2(%arg0: i32, %arg1: i32, %arg2: i32) -> (i32, i32) {
    %c0_i32 = arith.constant 0 : i32
    %c0_i32_0 = arith.constant 0 : i32
    return %c0_i32, %arg0 : i32, i32
  }
  func.func @transform_3(%arg0: i32, %arg1: i32, %arg2: i32) -> (i32, i32) {
    %c0_i32 = arith.constant 0 : i32
    return %arg1, %arg0 : i32, i32
  }
  func.func @transform_4(%arg0: i32, %arg1: i32, %arg2: i32) -> (i32, i32) {
    %c0_i32 = arith.constant 0 : i32
    %c0_i32_0 = arith.constant 0 : i32
    return %c0_i32, %arg0 : i32, i32
  }
  func.func @transform_5(%arg0: i32, %arg1: i32, %arg2: i32) -> (i32, i32) {
    %c0_i32 = arith.constant 0 : i32
    %c0_i32_0 = arith.constant 0 : i32
    return %c0_i32, %arg0 : i32, i32
  }
}

</mosaic_0001>

<bundles_post_ra>
// kernel: tpu_custom_call.1
= control target key start
LH: loop header
LB: loop body
LE: loop exit
PB: predicated region body
PF: predicated region fallthrough
CT: control target
= control target key end

     0   :  { %11 = vsyncpa [#allocation4], 0  ;;  %s589_s0 = inlined_call_operand.hbm [shape: bf16[16,128], index: 0, kind: input, shape index: {}]   ;;  %s590_s1 = inlined_call_operand.hbm [shape: bf16[128,128], index: 1, kind: input, shape index: {}]   ;;  %s591_s2 = inlined_call_operand.vmem [shape: f32[1,128], index: 2, kind: input, shape index: {}]   ;;  %s592_s3 = inlined_call_operand.hbm [shape: bf16[16,128], index: 3, kind: output, shape index: {0}]   ;;  %s593_s4 = inlined_call_operand.hbm [shape: f32[1,128], index: 4, kind: output, shape index: {1}]   ;;  %s594_s5 = inlined_call_operand.hbm [shape: f32[1,128], index: 5, kind: output, shape index: {2}]  }
   0x1   :  { %12 = vsyncpa [#allocation7], 0 }
   0x2   :  { %13 = vsyncpa [#allocation5], 0 }
   0x3   :  { %14 = vsyncpa [#allocation10], 0  ;;  %s467_s18 = smov [#allocation3]   ;;  %s349_s22 = scalar_lea.hbm %s589_s0, 128 }
   0x4   :  { %s20_s19 = sshll.u32 %s467_s18, 4  ;;  %p350_p0 = scmp.ne.s32.totalorder %s589_s0, %s349_s22  ;;  %s21_s19 = int_to_ptr.vmem [resolvable:$true] %s20_s19 }
   0x5   :  { %p353_p1 = scmp.lt.u32.totalorder %s349_s22, %s589_s0 }
   0x7   :  { %p355_p2 = pnand %p353_p1, %p350_p0 }
   0x9   :  { %358 = shalt.err (!%p355_p2)
}
   0xa   :  { %s359_s27 = scalar_lea.vmem %s21_s19, 128  ;;  %p364_p4 = scmp.lt.s32.totalorder %s21_s19, %s21_s19 }
   0xb   :  { %p360_p3 = scmp.ne.s32.totalorder %s21_s19, %s359_s27  ;;  %p365_p5 = scmp.lt.s32.totalorder %s359_s27, %s359_s27 }
   0xd   :  { %p366_p6 = por %p365_p5, %p364_p4 }
   0xf   :  { %p367_p7 = pnand %p366_p6, %p360_p3 }
  0x11   :  { %370 = shalt.err (!%p367_p7)
}
  0x12   :  { %s468_s28 = smov 64   ;;  %s469_s29 = smov 4  }
  0x13   :  { %26 = dma.hbm_to_vmem [thread:$0]  %s589_s0, 128, %s21_s19, [#allocation4], %s468_s28, %s468_s28, %s469_s29  }
  0x14   :  { %s470_s7 = smov [#allocation6]   ;;  %s371_s11 = scalar_lea.hbm %s590_s1, 1024 }
  0x15   :  { %s32_s8 = sshll.u32 %s470_s7, 4  ;;  %p372_p8 = scmp.ne.s32.totalorder %s590_s1, %s371_s11  ;;  %s33_s8 = int_to_ptr.vmem [resolvable:$true] %s32_s8 }
  0x16   :  { %p375_p9 = scmp.lt.u32.totalorder %s371_s11, %s590_s1 }
  0x18   :  { %p377_p10 = pnand %p375_p9, %p372_p8 }
  0x1a   :  { %380 = shalt.err (!%p377_p10)
}
  0x1b   :  { %s381_s16 = scalar_lea.vmem %s33_s8, 1024  ;;  %p386_p12 = scmp.lt.s32.totalorder %s33_s8, %s33_s8 }
  0x1c   :  { %p382_p11 = scmp.ne.s32.totalorder %s33_s8, %s381_s16  ;;  %p387_p13 = scmp.lt.s32.totalorder %s381_s16, %s381_s16 }
  0x1e   :  { %p388_p0 = por %p387_p13, %p386_p12 }
  0x20   :  { %p389_p1 = pnand %p388_p0, %p382_p11 }
  0x22   :  { %392 = shalt.err (!%p389_p1)
}
  0x23   :  { %38 = dma.hbm_to_vmem [thread:$0]  %s590_s1, 1024, %s33_s8, [#allocation7], %s468_s28, %s468_s28, %s469_s29  }
  0x24   :  { %459 = dma.done.wait [#allocation4], 128  }
  0x25   :  { %460 = vsyncadd [#allocation4], 4294967168 }
  0x26   :  { %461 = dma.done.wait [#allocation7], 1024  }
  0x27   :  { %462 = vsyncadd [#allocation7], 4294966272  ;;  %v471_v0 = vmov 0.0   ;;  %vm472_vm0 = vmmov 0   ;;  %v340_v1 = vld [vmem:[#allocation6] sm:$0xff]   ;;  %v341_v2 = vld [vmem:[#allocation6 + $0x8] sm:$0xff]  }
  0x28   :  { %311 = vmatprep.subr.bf16.mxu0 %v471_v0  ;;  %54 = vst [vmem:[#allocation9] sm:$0x1] %v471_v0  ;;  %55 = vst [vmem:[#allocation11] sm:$0x1] %v471_v0  ;;  %327 = vmatprep.mubr.msk.bf16.mxu0 %vm472_vm0, %v471_v0  ;;  %v342_v3 = vld [vmem:[#allocation6 + $0x10] sm:$0xff]   ;;  %v343_v4 = vld [vmem:[#allocation6 + $0x18] sm:$0xff]  }
  0x29   :  { %312 = vmatpush3.bf16.msra.mxu0 %v340_v1  ;;  %v344_v5 = vld [vmem:[#allocation6 + $0x20] sm:$0xff]   ;;  %v345_v6 = vld [vmem:[#allocation6 + $0x28] sm:$0xff]   ;;  %v346_v7 = vld [vmem:[#allocation6 + $0x30] sm:$0xff]   ;;  %s473_s19 = smov [#allocation8]  }
  0x2a   :  { %313 = vmatprep.subr.bf16.mxu0 %v471_v0  ;;  %v347_v8 = vld [vmem:[#allocation6 + $0x38] sm:$0xff]   ;;  %s243_s20 = sshll.u32 %s473_s19, 4  ;;  %s244_s20 = int_to_ptr.vmem [resolvable:$true] %s243_s20 }
  0x2b   :  { %v348_v9 = vld [vmem:[#allocation3] sm:$0xff]   ;;  %s393_s21 = scalar_lea.vmem %s244_s20, 128  ;;  %p398_p3 = scmp.lt.s32.totalorder %s244_s20, %s244_s20 }
  0x2c   :  { %v292_v10 = vld [vmem:[%s591_s2] ss:$0 sm:$0xff]  ;;  %p394_p2 = scmp.ne.s32.totalorder %s244_s20, %s393_s21  ;;  %p399_p4 = scmp.lt.s32.totalorder %s393_s21, %s393_s21 }
  0x2d   :  { %314 = vmatpush3.bf16.msra.mxu0 %v341_v2 }
  0x2e   :  { %315 = vmatprep.subr.bf16.mxu0 %v471_v0  ;;  %p400_p5 = por %p399_p4, %p398_p3 }
  0x30   :  { %p401_p6 = pnand %p400_p5, %p394_p2 }
  0x31   :  { %316 = vmatpush3.bf16.msra.mxu0 %v342_v3 }
  0x32   :  { %317 = vmatprep.subr.bf16.mxu0 %v471_v0 }
  0x35   :  { %318 = vmatpush3.bf16.msra.mxu0 %v343_v4 }
  0x36   :  { %319 = vmatprep.subr.bf16.mxu0 %v471_v0 }
  0x39   :  { %320 = vmatpush3.bf16.msra.mxu0 %v344_v5 }
  0x3a   :  { %321 = vmatprep.subr.bf16.mxu0 %v471_v0 }
  0x3d   :  { %322 = vmatpush3.bf16.msra.mxu0 %v345_v6 }
  0x3e   :  { %323 = vmatprep.subr.bf16.mxu0 %v471_v0 }
  0x41   :  { %324 = vmatpush3.bf16.msra.mxu0 %v346_v7 }
  0x42   :  { %325 = vmatprep.subr.bf16.mxu0 %v471_v0 }
  0x45   :  { %326 = vmatpush3.bf16.msra.mxu0 %v347_v8 }
  0x48   :  { %328 = vmatmul.mubr.bf16.vlgmr.msra.gmra.mrb[0].mxu0 %v348_v9 }
 0x11b   :  { %v169_v11 = vpop.f32.mrb[0].mxu0 }
 0x11c   :  { %v192_v12 = vadd.f32 %v292_v10, %v169_v11  ;;  %v329_v13 = vpop.f32.mrb[1].mxu0 }
 0x11d   :  { %v172_v14 = vpop.f32.mrb[2].mxu0 }
 0x11e   :  { %v193_v15 = vadd.f32 %v292_v10, %v172_v14  ;;  %v330_v16 = vpop.f32.mrb[3].mxu0  ;;  %v215_v17 = vmul.f32 %v192_v12, %v192_v12 }
 0x120   :  { %v205_v18 = vadd.f32 %v193_v15, %v192_v12  ;;  %v216_v19 = vmul.f32 %v193_v15, %v193_v15  ;;  %v300_v20 = vpack.c.bf16 %v193_v15, %v192_v12 }
 0x122   :  { %v206_v21 = vrot.slane %v205_v18, 4  ;;  %v217_v22 = vadd.f32 %v216_v19, %v215_v17  ;;  %301 = vst [vmem:[#allocation8] sm:$0xff] %v300_v20  }
 0x123   :  { %404 = shalt.err (!%p401_p6)
}
 0x124   :  { %s405_s24 = scalar_lea.hbm %s592_s3, 128 }
 0x125   :  { %p406_p7 = scmp.ne.s32.totalorder %s592_s3, %s405_s24  ;;  %p409_p8 = scmp.lt.u32.totalorder %s405_s24, %s592_s3 }
 0x127   :  { %p411_p9 = pnand %p409_p8, %p406_p7 }
 0x129   :  { %414 = shalt.err (!%p411_p9)
}
 0x12a   :  { %249 = dma.vmem_to_hbm [thread:$0]  %s244_s20, 128, %s592_s3, [#allocation5], %s468_s28, %s468_s28, %s469_s29   ;;  %v207_v23 = vadd.f32 %v206_v21, %v205_v18  ;;  %v218_v24 = vrot.slane %v217_v22, 4  ;;  %v204_v31 = vld [vmem:[#allocation9] sm:$0x1] }
 0x12b   :  { %v214_v34 = vld [vmem:[#allocation11] sm:$0x1]  ;;  %v228_v37 = vld [vmem:[%s591_s2] sm:$0x1]  ;;  %s474_s3 = smov [#allocation9]   ;;  %s475_s29 = smov [#allocation11]  }
 0x12c   :  { %v208_v25 = vrot.slane %v207_v23, 2  ;;  %v219_v26 = vadd.f32 %v218_v24, %v217_v22  ;;  %v234_v39 = vmul.f32 %v228_v37, %v228_v37  ;;  %v230_v40 = vmul.f32 8.0, %v228_v37  ;;  %s256_s28 = sshll.u32 %s474_s3, 4  ;;  %s266_s10 = sshll.u32 %s475_s29, 4  ;;  %s257_s28 = int_to_ptr.vmem [resolvable:$true] %s256_s28  ;;  %s557_s10 = int_to_ptr.vmem [resolvable:$true] %s266_s10 }
 0x12d   :  { %s415_s11 = scalar_lea.vmem %s257_s28, 16  ;;  %s419_s2 = scalar_lea.vmem %s257_s28, 32 }
 0x12e   :  { %v209_v27 = vadd.f32 %v208_v25, %v207_v23  ;;  %v220_v28 = vrot.slane %v219_v26, 2  ;;  %v235_v41 = vmul.f32 8.0, %v234_v39  ;;  %p416_p10 = scmp.ne.s32.totalorder %s257_s28, %s415_s11  ;;  %p420_p11 = scmp.lt.s32.totalorder %s257_s28, %s257_s28 }
 0x12f   :  { %p421_p12 = scmp.lt.s32.totalorder %s419_s2, %s415_s11 }
 0x130   :  { %v210_v29 = vrot.slane %v209_v27, 1  ;;  %v221_v30 = vadd.f32 %v220_v28, %v219_v26 }
 0x131   :  { %p422_p13 = por %p421_p12, %p420_p11 }
 0x132   :  { %v211_v32 = vadd.f32 %v210_v29, %v209_v27  ;;  %v222_v33 = vrot.slane %v221_v30, 1 }
 0x133   :  { %p423_p0 = pnand %p422_p13, %p416_p10 }
 0x134   :  { %v223_v35 = vadd.f32 %v222_v33, %v221_v30  ;;  %v212_v36 = vadd.f32 %v211_v32, %v204_v31 }
 0x136   :  { %213 = vst [vmem:[#allocation9] sm:$0x1] %v212_v36  ;;  %v224_v38 = vadd.f32 %v223_v35, %v214_v34 }
 0x138   :  { %225 = vst [vmem:[#allocation11] sm:$0x1] %v224_v38 }
 0x13d   :  { %v229_v42 = vld [vmem:[#allocation9] sm:$0x1] }
 0x13e   :  { %v231_v43 = vsub.f32 %v229_v42, %v230_v40 }
 0x13f   :  { %v233_v44 = vld [vmem:[#allocation11] sm:$0x1] }
 0x140   :  { %232 = vst [vmem:[#allocation9] sm:$0x1] %v231_v43  ;;  %v236_v45 = vsub.f32 %v233_v44, %v235_v41 }
 0x141   :  { %426 = shalt.err (!%p423_p0)
}
 0x142   :  { %s427_s14 = scalar_lea.hbm %s593_s4, 16 }
 0x143   :  { %p428_p1 = scmp.ne.s32.totalorder %s593_s4, %s427_s14  ;;  %p431_p2 = scmp.lt.u32.totalorder %s427_s14, %s593_s4 }
 0x145   :  { %p433_p3 = pnand %p431_p2, %p428_p1 }
 0x147   :  { %436 = shalt.err (!%p433_p3)
}
 0x148   :  { %259 = dma.vmem_to_hbm [thread:$0]  %s257_s28, 16, %s593_s4, [#allocation10]   ;;  %237 = vst [vmem:[#allocation11] sm:$0x1] %v236_v45 }
 0x149   :  { %s437_s19 = scalar_lea.vmem %s557_s10, 16  ;;  %s441_s20 = scalar_lea.vmem %s557_s10, 32 }
 0x14a   :  { %p438_p4 = scmp.ne.s32.totalorder %s557_s10, %s437_s19  ;;  %p442_p5 = scmp.lt.s32.totalorder %s557_s10, %s557_s10 }
 0x14b   :  { %p443_p6 = scmp.lt.s32.totalorder %s441_s20, %s437_s19 }
 0x14d   :  { %p444_p7 = por %p443_p6, %p442_p5 }
 0x14f   :  { %p445_p8 = pnand %p444_p7, %p438_p4 }
 0x151   :  { %448 = shalt.err (!%p445_p8)
}
 0x152   :  { %s449_s23 = scalar_lea.hbm %s594_s5, 16 }
 0x153   :  { %p450_p9 = scmp.ne.s32.totalorder %s594_s5, %s449_s23  ;;  %p453_p10 = scmp.lt.u32.totalorder %s449_s23, %s594_s5 }
 0x155   :  { %p455_p11 = pnand %p453_p10, %p450_p9 }
 0x157   :  { %458 = shalt.err (!%p455_p11)
}
 0x158   :  { %269 = dma.vmem_to_hbm [thread:$0]  %s557_s10, 16, %s594_s5, [#allocation10]  }
 0x159   :  { %463 = dma.done.wait [#allocation5], 128  }
 0x15a   :  { %464 = vsyncadd [#allocation5], 4294967168 }
 0x15b   :  { %465 = dma.done.wait [#allocation10], 32  }
 0x15c   :  { %466 = vsyncadd [#allocation10], 4294967264 }
 0x15d   :  { %279 = vsyncpa [#allocation4], 1 }
 0x15e   :  { %280 = vsyncpa [#allocation7], 1 }
 0x15f   :  { %281 = vsyncpa [#allocation5], 1 }
 0x160   :  { %282 = vsyncpa [#allocation10], 1 }

</bundles_post_ra>
